<compile_context>
chip_gen: v6e
topology: v6e:2x2x1
jax: 0.10.0
libtpu: 0.0.40
codegen_flags: <defaults>
</compile_context>

<pallas_src>
import functools

import jax
import jax.numpy as jnp
import numpy as np
from jax.experimental import pallas as pl
from jax.experimental.pallas import tpu as pltpu


def _round_up(x, m):
    return ((x + m - 1) // m) * m


# ----------------------------- Pallas kernel -------------------------------
def _critic_kernel(pi_ref, act_ref,
                   w1p_ref, w1a_ref, b1_ref,
                   w2_ref, b2_ref,
                   w3_ref, b3_ref,
                   out_ref):
    # Concat-free first layer (1/act_limit already folded into w1a in the wrapper):
    #   concat([pi, act/limit]) @ W1 == pi @ W1[:d_pi] + act @ (W1[d_pi:] / limit)
    h = jnp.dot(pi_ref[...], w1p_ref[...], preferred_element_type=jnp.float32)
    h = h + jnp.dot(act_ref[...], w1a_ref[...], preferred_element_type=jnp.float32)
    h = jnp.maximum(h + b1_ref[...], 0.0)

    # Hidden layer 2: ReLU(h @ W2 + b2)   (astype is a no-op on the f32 path)
    h = jnp.dot(h.astype(w2_ref.dtype), w2_ref[...],
                preferred_element_type=jnp.float32) + b2_ref[...]
    h = jnp.maximum(h, 0.0)

    # Output layer: h @ W3 + b3 -> (block_b, 1) column.
    q = jnp.dot(h.astype(w3_ref.dtype), w3_ref[...],
                preferred_element_type=jnp.float32) + b3_ref[...]

    # Lane-dense store: (block_b, 1) -> (1, block_b) relayout so the output store
    # is an unmasked full-lane vst instead of 1-useful-lane masked stores.
    # TODO(synk): confirm via bundle dump this lowers to XLU vxpose, not a VMEM copy.
    out_ref[0] = jnp.transpose(q).astype(out_ref.dtype)


# ------------------------------- wrapper ------------------------------------
def critic_forward(pi_inputs, actions, params, act_limit, *,
                   block_b=2048, compute_dtype=jnp.float32):
    """Pallas-backed Critic forward. Returns q_values with trailing size-1 dim squeezed.

    compute_dtype=jnp.bfloat16 feeds bf16 operands to the MXU (f32 accumulation);
    choose f32 vs bf16 on tolerance requirements, not chip generation.
    """
    w1, b1, w2, b2, w3, b3 = params
    B, d_pi = pi_inputs.shape
    d_act = actions.shape[-1]

    # --- tile-size selection (overhead-bound kernel: fewer, bigger steps) -----
    block_b_eff = min(block_b, _round_up(B, 8))
    num_tiles = -(-B // block_b_eff)
    if num_tiles > 1 and num_tiles % 2 == 1:
        # Nudge to an even tile count so v7x's 2 TensorCores both get work.
        target = num_tiles + 1
        block_b_eff = _round_up(-(-B // target), 8)
        num_tiles = -(-B // block_b_eff)

    # Split W1 once so the kernel never concatenates along the lane axis, and
    # fold the 1/act_limit scale into the action rows (zero per-step cost).
    w1_pi = w1[:d_pi, :]
    w1_act = w1[d_pi:, :] * (1.0 / float(act_limit))

    # Wrapper-side dtype prep: cast matmul operands once (weights are loop
    # invariant; in-kernel casts would repeat every grid step).  Biases stay f32.
    if compute_dtype != jnp.float32:
        pi_inputs = pi_inputs.astype(compute_dtype)
        actions = actions.astype(compute_dtype)
        w1_pi = w1_pi.astype(compute_dtype)
        w1_act = w1_act.astype(compute_dtype)
        w2 = w2.astype(compute_dtype)
        w3 = w3.astype(compute_dtype)
    b1 = b1.astype(jnp.float32)
    b2 = b2.astype(jnp.float32)
    b3 = b3.astype(jnp.float32)

    def full_spec(shape):
        zeros = (0,) * len(shape)
        return pl.BlockSpec(shape, lambda i, _z=zeros: _z)

    out = pl.pallas_call(
        _critic_kernel,
        out_shape=jax.ShapeDtypeStruct((num_tiles, 1, block_b_eff), jnp.float32),
        grid=(num_tiles,),
        in_specs=[
            # Partial trailing block is fine: rows are independent and output
            # rows >= B are discarded below.  No jnp.pad of the inputs.
            pl.BlockSpec((block_b_eff, d_pi), lambda i: (i, 0)),
            pl.BlockSpec((block_b_eff, d_act), lambda i: (i, 0)),
            full_spec(w1_pi.shape),
            full_spec(w1_act.shape),
            full_spec(b1.shape),
            full_spec(w2.shape),
            full_spec(b2.shape),
            full_spec(w3.shape),
            full_spec(b3.shape),
        ],
        out_specs=pl.BlockSpec((1, 1, block_b_eff), lambda i: (i, 0, 0)),
        compiler_params=pltpu.CompilerParams(
            dimension_semantics=("parallel",)),
    )(pi_inputs, actions, w1_pi, w1_act, b1, w2, b2, w3, b3)

    q = out.reshape(num_tiles * block_b_eff)[:B]
    return jnp.squeeze(q)  # matches torch .squeeze() (B=1 -> scalar)


# ----------------------- deterministic parameter init -----------------------
def init_critic_params(key, input_dim, hid_size, n_hids):
    """PyTorch-nn.Linear-style uniform init, deterministic from `key`.
    Weights stored as (fan_in, fan_out); biases as (1, fan_out) for TPU-friendly 2D refs."""
    dims = [input_dim] + [hid_size] * n_hids + [1]
    params = []
    for fan_in, fan_out in zip(dims[:-1], dims[1:]):
        key, kw, kb = jax.random.split(key, 3)
        bound = 1.0 / np.sqrt(fan_in)
        w = jax.random.uniform(kw, (fan_in, fan_out), jnp.float32, -bound, bound)
        b = jax.random.uniform(kb, (1, fan_out), jnp.float32, -bound, bound)
        params += [w, b]
    return tuple(params)


# --------------------------- pure-JAX reference ------------------------------
def critic_reference(pi_inputs, actions, params, act_limit):
    w1, b1, w2, b2, w3, b3 = params
    x = jnp.concatenate([pi_inputs, actions / act_limit], axis=-1)
    h = jnp.maximum(x @ w1 + b1, 0.0)
    h = jnp.maximum(h @ w2 + b2, 0.0)
    return jnp.squeeze(h @ w3 + b3)


if __name__ == "__main__":
    # Small env config consistent with the module:
    #   obs=10, goal=3, action=4 -> input_dim=17 ; hid_size=32 ; n_hids=2 ; act_limit=2.0
    OBS, GOAL, ACT = 10, 3, 4
    HID, N_HIDS = 32, 2
    ACT_LIMIT = 2.0

    key = jax.random.PRNGKey(0)
    k_pi, k_act, k_par = jax.random.split(key, 3)
    params = init_critic_params(k_par, OBS + GOAL + ACT, HID, N_HIDS)

    # Case 1: ragged small batch -> single grid step with a 304-row tile (no padding pass).
    B = 300
    pi_inputs = jax.random.normal(k_pi, (B, OBS + GOAL), jnp.float32)
    actions = jax.random.uniform(k_act, (B, ACT), jnp.float32, -ACT_LIMIT, ACT_LIMIT)
    q = jax.block_until_ready(critic_forward(pi_inputs, actions, params, ACT_LIMIT))
    q_ref = critic_reference(pi_inputs, actions, params, ACT_LIMIT)
    np.testing.assert_allclose(np.asarray(q), np.asarray(q_ref), rtol=1e-4, atol=1e-5)

    # Case 2: multi-tile path (even tile count + partial trailing block).
    B2 = 600
    pi2 = jax.random.normal(jax.random.PRNGKey(1), (B2, OBS + GOAL), jnp.float32)
    act2 = jax.random.uniform(jax.random.PRNGKey(2), (B2, ACT), jnp.float32,
                              -ACT_LIMIT, ACT_LIMIT)
    q2 = jax.block_until_ready(
        critic_forward(pi2, act2, params, ACT_LIMIT, block_b=256))
    q2_ref = critic_reference(pi2, act2, params, ACT_LIMIT)
    np.testing.assert_allclose(np.asarray(q2), np.asarray(q2_ref), rtol=1e-4, atol=1e-5)

    print("KERNEL_OK")
</pallas_src>

<mosaic_0001>
module attributes {stable_mosaic.version = 11 : i64} {
  func.func @_critic_kernel(%arg0: i32, %arg1: memref<304x13xf32, #tpu.memory_space<vmem>>, %arg2: memref<304x4xf32, #tpu.memory_space<vmem>>, %arg3: memref<13x32xf32, #tpu.memory_space<vmem>>, %arg4: memref<4x32xf32, #tpu.memory_space<vmem>>, %arg5: memref<1x32xf32, #tpu.memory_space<vmem>>, %arg6: memref<32x32xf32, #tpu.memory_space<vmem>>, %arg7: memref<1x32xf32, #tpu.memory_space<vmem>>, %arg8: memref<32x1xf32, #tpu.memory_space<vmem>>, %arg9: memref<1x1xf32, #tpu.memory_space<vmem>>, %arg10: memref<1x1x304xf32, #tpu.memory_space<vmem>>) attributes {dimension_semantics = [#tpu.dimension_semantics<parallel>], iteration_bounds = array<i64: 1>, scalar_prefetch = 0 : i64, scratch_operands = 0 : i64, tpu.core_type = #tpu.core_type<tc>, window_params = [{transform_indices = @transform_0, window_bounds = array<i64: 304, 13>}, {transform_indices = @transform_1, window_bounds = array<i64: 304, 4>}, {pipeline_mode = #tpu.pipeline_mode<synchronous>, transform_indices = @transform_2, window_bounds = array<i64: 13, 32>}, {pipeline_mode = #tpu.pipeline_mode<synchronous>, transform_indices = @transform_3, window_bounds = array<i64: 4, 32>}, {pipeline_mode = #tpu.pipeline_mode<synchronous>, transform_indices = @transform_4, window_bounds = array<i64: 1, 32>}, {pipeline_mode = #tpu.pipeline_mode<synchronous>, transform_indices = @transform_5, window_bounds = array<i64: 32, 32>}, {pipeline_mode = #tpu.pipeline_mode<synchronous>, transform_indices = @transform_6, window_bounds = array<i64: 1, 32>}, {pipeline_mode = #tpu.pipeline_mode<synchronous>, transform_indices = @transform_7, window_bounds = array<i64: 32, 1>}, {pipeline_mode = #tpu.pipeline_mode<synchronous>, transform_indices = @transform_8, window_bounds = array<i64: 1, 1>}, {transform_indices = @transform_9, window_bounds = array<i64: 1, 1, 304>}]} {
    %c0 = arith.constant 0 : index
    %c0_0 = arith.constant 0 : index
    %0 = vector.load %arg1[%c0, %c0_0] : memref<304x13xf32, #tpu.memory_space<vmem>>, vector<304x13xf32>
    %c0_1 = arith.constant 0 : index
    %c0_2 = arith.constant 0 : index
    %1 = vector.load %arg3[%c0_1, %c0_2] : memref<13x32xf32, #tpu.memory_space<vmem>>, vector<13x32xf32>
    %cst = arith.constant dense<0.000000e+00> : vector<304x32xf32>
    %2 = tpu.matmul %0, %1, %cst {dimension_numbers = #tpu.dot_dimension_numbers<[1], [0], [0], [1], [0, 0, 1, 1], [], []>} : vector<304x13xf32>, vector<13x32xf32>, vector<304x32xf32> -> vector<304x32xf32>
    %c0_3 = arith.constant 0 : index
    %c0_4 = arith.constant 0 : index
    %3 = vector.load %arg2[%c0_3, %c0_4] : memref<304x4xf32, #tpu.memory_space<vmem>>, vector<304x4xf32>
    %c0_5 = arith.constant 0 : index
    %c0_6 = arith.constant 0 : index
    %4 = vector.load %arg4[%c0_5, %c0_6] : memref<4x32xf32, #tpu.memory_space<vmem>>, vector<4x32xf32>
    %cst_7 = arith.constant dense<0.000000e+00> : vector<304x32xf32>
    %5 = tpu.matmul %3, %4, %cst_7 {dimension_numbers = #tpu.dot_dimension_numbers<[1], [0], [0], [1], [0, 0, 1, 1], [], []>} : vector<304x4xf32>, vector<4x32xf32>, vector<304x32xf32> -> vector<304x32xf32>
    %6 = arith.addf %2, %5 : vector<304x32xf32>
    %c0_8 = arith.constant 0 : index
    %c0_9 = arith.constant 0 : index
    %7 = vector.load %arg5[%c0_8, %c0_9] : memref<1x32xf32, #tpu.memory_space<vmem>>, vector<1x32xf32>
    %8 = vector.broadcast %7 : vector<1x32xf32> to vector<304x32xf32>
    %9 = arith.addf %6, %8 : vector<304x32xf32>
    %cst_10 = arith.constant 0.000000e+00 : f32
    %10 = vector.broadcast %cst_10 : f32 to vector<304x32xf32>
    %11 = arith.maximumf %9, %10 : vector<304x32xf32>
    %c0_11 = arith.constant 0 : index
    %c0_12 = arith.constant 0 : index
    %12 = vector.load %arg6[%c0_11, %c0_12] : memref<32x32xf32, #tpu.memory_space<vmem>>, vector<32x32xf32>
    %cst_13 = arith.constant dense<0.000000e+00> : vector<304x32xf32>
    %13 = tpu.matmul %11, %12, %cst_13 {dimension_numbers = #tpu.dot_dimension_numbers<[1], [0], [0], [1], [0, 0, 1, 1], [], []>} : vector<304x32xf32>, vector<32x32xf32>, vector<304x32xf32> -> vector<304x32xf32>
    %c0_14 = arith.constant 0 : index
    %c0_15 = arith.constant 0 : index
    %14 = vector.load %arg7[%c0_14, %c0_15] : memref<1x32xf32, #tpu.memory_space<vmem>>, vector<1x32xf32>
    %15 = vector.broadcast %14 : vector<1x32xf32> to vector<304x32xf32>
    %16 = arith.addf %13, %15 : vector<304x32xf32>
    %cst_16 = arith.constant 0.000000e+00 : f32
    %17 = vector.broadcast %cst_16 : f32 to vector<304x32xf32>
    %18 = arith.maximumf %16, %17 : vector<304x32xf32>
    %c0_17 = arith.constant 0 : index
    %c0_18 = arith.constant 0 : index
    %19 = vector.load %arg8[%c0_17, %c0_18] : memref<32x1xf32, #tpu.memory_space<vmem>>, vector<32x1xf32>
    %cst_19 = arith.constant dense<0.000000e+00> : vector<304x1xf32>
    %20 = tpu.matmul %18, %19, %cst_19 {dimension_numbers = #tpu.dot_dimension_numbers<[1], [0], [0], [1], [0, 0, 1, 1], [], []>} : vector<304x32xf32>, vector<32x1xf32>, vector<304x1xf32> -> vector<304x1xf32>
    %c0_20 = arith.constant 0 : index
    %c0_21 = arith.constant 0 : index
    %21 = vector.load %arg9[%c0_20, %c0_21] : memref<1x1xf32, #tpu.memory_space<vmem>>, vector<1x1xf32>
    %22 = vector.broadcast %21 : vector<1x1xf32> to vector<304x1xf32>
    %23 = arith.addf %20, %22 : vector<304x1xf32>
    %24 = tpu.transpose %23, [1, 0] : vector<304x1xf32> -> vector<1x304xf32>
    %c0_22 = arith.constant 0 : index
    %c0_23 = arith.constant 0 : index
    %c0_24 = arith.constant 0 : index
    %25 = vector.load %arg10[%c0_22, %c0_23, %c0_24] : memref<1x1x304xf32, #tpu.memory_space<vmem>>, vector<1x1x304xf32>
    %26 = vector.shape_cast %25 : vector<1x1x304xf32> to vector<1x304xf32>
    %27 = vector.shape_cast %24 : vector<1x304xf32> to vector<1x1x304xf32>
    tpu.vector_store %arg10[%c0_22, %c0_23, %c0_24], %27 {strides = array<i32>} : memref<1x1x304xf32, #tpu.memory_space<vmem>>, vector<1x1x304xf32>,
    return
  }
  func.func @transform_0(%arg0: i32) -> (i32, i32) {
    %c0_i32 = arith.constant 0 : i32
    %c0_i32_0 = arith.constant 0 : i32
    return %arg0, %c0_i32 : i32, i32
  }
  func.func @transform_1(%arg0: i32) -> (i32, i32) {
    %c0_i32 = arith.constant 0 : i32
    %c0_i32_0 = arith.constant 0 : i32
    return %arg0, %c0_i32 : i32, i32
  }
  func.func @transform_2(%arg0: i32) -> (i32, i32) {
    %c0_i32 = arith.constant 0 : i32
    %c0_i32_0 = arith.constant 0 : i32
    %c0_i32_1 = arith.constant 0 : i32
    return %c0_i32, %c0_i32_0 : i32, i32
  }
  func.func @transform_3(%arg0: i32) -> (i32, i32) {
    %c0_i32 = arith.constant 0 : i32
    %c0_i32_0 = arith.constant 0 : i32
    %c0_i32_1 = arith.constant 0 : i32
    return %c0_i32, %c0_i32_0 : i32, i32
  }
  func.func @transform_4(%arg0: i32) -> (i32, i32) {
    %c0_i32 = arith.constant 0 : i32
    %c0_i32_0 = arith.constant 0 : i32
    %c0_i32_1 = arith.constant 0 : i32
    return %c0_i32, %c0_i32_0 : i32, i32
  }
  func.func @transform_5(%arg0: i32) -> (i32, i32) {
    %c0_i32 = arith.constant 0 : i32
    %c0_i32_0 = arith.constant 0 : i32
    %c0_i32_1 = arith.constant 0 : i32
    return %c0_i32, %c0_i32_0 : i32, i32
  }
  func.func @transform_6(%arg0: i32) -> (i32, i32) {
    %c0_i32 = arith.constant 0 : i32
    %c0_i32_0 = arith.constant 0 : i32
    %c0_i32_1 = arith.constant 0 : i32
    return %c0_i32, %c0_i32_0 : i32, i32
  }
  func.func @transform_7(%arg0: i32) -> (i32, i32) {
    %c0_i32 = arith.constant 0 : i32
    %c0_i32_0 = arith.constant 0 : i32
    %c0_i32_1 = arith.constant 0 : i32
    return %c0_i32, %c0_i32_0 : i32, i32
  }
  func.func @transform_8(%arg0: i32) -> (i32, i32) {
    %c0_i32 = arith.constant 0 : i32
    %c0_i32_0 = arith.constant 0 : i32
    %c0_i32_1 = arith.constant 0 : i32
    return %c0_i32, %c0_i32_0 : i32, i32
  }
  func.func @transform_9(%arg0: i32) -> (i32, i32, i32) {
    %c0_i32 = arith.constant 0 : i32
    %c0_i32_0 = arith.constant 0 : i32
    %c0_i32_1 = arith.constant 0 : i32
    return %arg0, %c0_i32, %c0_i32_0 : i32, i32, i32
  }
}

</mosaic_0001>

<bundles_post_ra>
// kernel: tpu_custom_call.1
= control target key start
LH: loop header
LB: loop body
LE: loop exit
PB: predicated region body
PF: predicated region fallthrough
CT: control target
= control target key end

     0   :  { %s3078_s0 = inlined_call_operand.vmem [shape: f32[300,13], index: 0, kind: input, shape index: {}]   ;;  %s3079_s1 = inlined_call_operand.vmem [shape: f32[300,4], index: 1, kind: input, shape index: {}]   ;;  %s3080_s2 = inlined_call_operand.vmem [shape: f32[13,32], index: 2, kind: input, shape index: {}]   ;;  %s3081_s3 = inlined_call_operand.vmem [shape: f32[4,32], index: 3, kind: input, shape index: {}]   ;;  %s3082_s4 = inlined_call_operand.vmem [shape: f32[1,32], index: 4, kind: input, shape index: {}]   ;;  %s3083_s5 = inlined_call_operand.vmem [shape: f32[32,32], index: 5, kind: input, shape index: {}]   ;;  %s3084_s6 = inlined_call_operand.vmem [shape: f32[1,32], index: 6, kind: input, shape index: {}]   ;;  %s3085_s7 = inlined_call_operand.vmem [shape: f32[32,1], index: 7, kind: input, shape index: {}]   ;;  %s3086_s8 = inlined_call_operand.<no memory space> [shape: f32[1,1], index: 8, kind: input, shape index: {}]   ;;  %s3087_s9 = inlined_call_operand.hbm [shape: f32[1,1,304], index: 9, kind: output, shape index: {}]  }
   0x1   :  { %v14_v0 = vstv %s3086_s8 }
   0x2   :  { %15 = vst [vmem:[#allocation2] sm:$0x1] %v14_v0 }
   0x3   :  { %v113_v1 = vld [vmem:[%s3081_s3] sm:$0xf]  ;;  %vm229_vm0 = vcmask 1043456   ;;  %v74_v2 = vld [vmem:[%s3080_s2 + $0x8] sm:$0x1f]  ;;  %vm603_vm1 = vcmask 1044480  }
   0x4   :  { %2206 = vmatprep.subr.msk.mxu0 %vm229_vm0, %v113_v1  ;;  %2265 = vmatprep.subr.msk.mxu1 %vm603_vm1, %v74_v2  ;;  %v75_v3 = vld [vmem:[%s3079_s1] sm:$0xff]  ;;  %vm114_vm2 = vcmask 31744   ;;  %v76_v4 = vld [vmem:[%s3079_s1 + $0x8] sm:$0xff]  ;;  %vm488_vm3 = vcmask 105472   ;;  %v77_v7 = vld [vmem:[%s3079_s1 + $0x10] sm:$0xff] }
   0x5   :  { %v73_v5 = vld [vmem:[%s3080_s2] sm:$0xff]  ;;  %2207 = vmatpush3.msk.msra.mxu0 %vm229_vm0, %v113_v1  ;;  %2208 = vmatprep.mubr.msk.f32.mxu0 %vm114_vm2, %v75_v3  ;;  %v36_v8 = vld [vmem:[%s3078_s0 + $0x8] sm:$0xff]  ;;  %v78_v9 = vld [vmem:[%s3079_s1 + $0x18] sm:$0xff] }
   0x6   :  { %v35_v6 = vld [vmem:[%s3078_s0] sm:$0xff]  ;;  %2266 = vmatpush3.msk.msra.mxu1 %vm603_vm1, %v74_v2  ;;  %2209 = vmatmul.mubr.msk.f32.vlgmr.msra.gmra.mxu0 %vm114_vm2, %v76_v4  ;;  %v37_v10 = vld [vmem:[%s3078_s0 + $0x10] sm:$0xff]  ;;  %v38_v12 = vld [vmem:[%s3078_s0 + $0x18] sm:$0xff] }
   0x7   :  { %2267 = vmatprep.subr.mxu1 %v73_v5  ;;  %2269 = vmatprep.mubr.msk.f32.mxu1 %vm488_vm3, %v35_v6  ;;  %v79_v11 = vld [vmem:[%s3079_s1 + $0x20] sm:$0xff]  ;;  %v80_v13 = vld [vmem:[%s3079_s1 + $0x28] sm:$0xff]  ;;  %v81_v15 = vld [vmem:[%s3079_s1 + $0x30] sm:$0xff] }
   0x8   :  { %2268 = vmatpush3.msra.mxu1 %v73_v5  ;;  %2211 = vmatprep.mubr.msk.f32.mxu0 %vm114_vm2, %v77_v7  ;;  %v39_v14 = vld [vmem:[%s3078_s0 + $0x20] sm:$0xff]  ;;  %v40_v16 = vld [vmem:[%s3078_s0 + $0x28] sm:$0xff]  ;;  %v82_v17 = vld [vmem:[%s3079_s1 + $0x38] sm:$0xff] }
   0x9   :  { %2270 = vmatmul.mubr.msk.f32.vlgmr.msra.gmra.mxu1 %vm488_vm3, %v36_v8  ;;  %v41_v18 = vld [vmem:[%s3078_s0 + $0x30] sm:$0xff]  ;;  %v83_v19 = vld [vmem:[%s3079_s1 + $0x40] sm:$0xff]  ;;  %v42_v20 = vld [vmem:[%s3078_s0 + $0x38] sm:$0xff] }
   0xa   :  { %2212 = vmatmul.mubr.msk.f32.gmra.mxu0 %vm114_vm2, %v78_v9  ;;  %2272 = vmatprep.mubr.msk.f32.mxu1 %vm488_vm3, %v37_v10  ;;  %v84_v21 = vld [vmem:[%s3079_s1 + $0x48] sm:$0xff]  ;;  %v43_v22 = vld [vmem:[%s3078_s0 + $0x40] sm:$0xff]  ;;  %v85_v23 = vld [vmem:[%s3079_s1 + $0x50] sm:$0xff] }
   0xb   :  { %2214 = vmatprep.mubr.msk.f32.mxu0 %vm114_vm2, %v79_v11  ;;  %v44_v24 = vld [vmem:[%s3078_s0 + $0x48] sm:$0xff]  ;;  %v86_v25 = vld [vmem:[%s3079_s1 + $0x58] sm:$0xff]  ;;  %v45_v26 = vld [vmem:[%s3078_s0 + $0x50] sm:$0xff] }
   0xc   :  { %v87_v27 = vld [vmem:[%s3079_s1 + $0x60] sm:$0xff]  ;;  %v46_v28 = vld [vmem:[%s3078_s0 + $0x58] sm:$0xff]  ;;  %v88_v29 = vld [vmem:[%s3079_s1 + $0x68] sm:$0xff] }
   0xd   :  { %2273 = vmatmul.mubr.msk.f32.gmra.mxu1 %vm488_vm3, %v38_v12  ;;  %v47_v30 = vld [vmem:[%s3078_s0 + $0x60] sm:$0xff]  ;;  %v89_v31 = vld [vmem:[%s3079_s1 + $0x70] sm:$0xff]  ;;  %v948_v32 = vld [vmem:[%s3083_s5 + $0x18] sm:$0xff] }
   0xe   :  { %2215 = vmatmul.mubr.msk.f32.gmra.mxu0 %vm114_vm2, %v80_v13  ;;  %2275 = vmatprep.mubr.msk.f32.mxu1 %vm488_vm3, %v39_v14  ;;  %v48_v33 = vld [vmem:[%s3078_s0 + $0x68] sm:$0xff]  ;;  %v947_v34 = vld [vmem:[%s3083_s5 + $0x10] sm:$0xff]  ;;  %v90_v35 = vld [vmem:[%s3079_s1 + $0x78] sm:$0xff] }
   0xf   :  { %2217 = vmatprep.mubr.msk.f32.mxu0 %vm114_vm2, %v81_v15  ;;  %v49_v36 = vld [vmem:[%s3078_s0 + $0x70] sm:$0xff]  ;;  %2326 = vmatprep.subr.mxu0 %v948_v32 }
  0x11   :  { %2276 = vmatmul.mubr.msk.f32.gmra.mxu1 %vm488_vm3, %v40_v16 }
  0x12   :  { %2218 = vmatmul.mubr.msk.f32.gmra.mxu0 %vm114_vm2, %v82_v17  ;;  %2278 = vmatprep.mubr.msk.f32.mxu1 %vm488_vm3, %v41_v18 }
  0x13   :  { %2220 = vmatprep.mubr.msk.f32.mxu0 %vm114_vm2, %v83_v19 }
  0x15   :  { %2279 = vmatmul.mubr.msk.f32.gmra.mxu1 %vm488_vm3, %v42_v20 }
  0x16   :  { %2221 = vmatmul.mubr.msk.f32.gmra.mxu0 %vm114_vm2, %v84_v21  ;;  %2281 = vmatprep.mubr.msk.f32.mxu1 %vm488_vm3, %v43_v22 }
  0x17   :  { %2223 = vmatprep.mubr.msk.f32.mxu0 %vm114_vm2, %v85_v23 }
  0x19   :  { %2282 = vmatmul.mubr.msk.f32.gmra.mxu1 %vm488_vm3, %v44_v24 }
  0x1a   :  { %2224 = vmatmul.mubr.msk.f32.gmra.mxu0 %vm114_vm2, %v86_v25  ;;  %2284 = vmatprep.mubr.msk.f32.mxu1 %vm488_vm3, %v45_v26 }
  0x1b   :  { %2226 = vmatprep.mubr.msk.f32.mxu0 %vm114_vm2, %v87_v27 }
  0x1d   :  { %2285 = vmatmul.mubr.msk.f32.gmra.mxu1 %vm488_vm3, %v46_v28 }
  0x1e   :  { %2227 = vmatmul.mubr.msk.f32.gmra.mxu0 %vm114_vm2, %v88_v29  ;;  %2287 = vmatprep.mubr.msk.f32.mxu1 %vm488_vm3, %v47_v30 }
  0x1f   :  { %2229 = vmatprep.mubr.msk.f32.mxu0 %vm114_vm2, %v89_v31 }
  0x20   :  { %16 = vsyncpa [#allocation4], 0  ;;  %v91_v37 = vld [vmem:[%s3079_s1 + $0x80] sm:$0xff]  ;;  %2327 = vmatpush3.msra.mxu0 %v948_v32  ;;  %v946_v38 = vld [vmem:[%s3083_s5 + $0x8] sm:$0xff]  ;;  %vm956_vm4 = vcmask 261120  }
  0x21   :  { %2288 = vmatmul.mubr.msk.f32.gmra.mxu1 %vm488_vm3, %v48_v33  ;;  %2328 = vmatprep.subr.mxu0 %v947_v34  ;;  %v50_v39 = vld [vmem:[%s3078_s0 + $0x78] sm:$0xff]  ;;  %v92_v40 = vld [vmem:[%s3079_s1 + $0x88] sm:$0xff]  ;;  %v51_v41 = vld [vmem:[%s3078_s0 + $0x80] sm:$0xff] }
  0x22   :  { %2230 = vmatmul.mubr.msk.f32.gmra.mxu0 %vm114_vm2, %v90_v35  ;;  %2290 = vmatprep.mubr.msk.f32.mxu1 %vm488_vm3, %v49_v36  ;;  %v93_v42 = vld [vmem:[%s3079_s1 + $0x90] sm:$0xff]  ;;  %v945_v43 = vld [vmem:[%s3083_s5] sm:$0xff]  ;;  %v52_v44 = vld [vmem:[%s3078_s0 + $0x88] sm:$0xff] }
  0x23   :  { %2232 = vmatprep.mubr.msk.f32.mxu0 %vm114_vm2, %v91_v37  ;;  %2329 = vmatpush3.msra.mxu0 %v947_v34  ;;  %v94_v45 = vld [vmem:[%s3079_s1 + $0x98] sm:$0xff]  ;;  %v53_v46 = vld [vmem:[%s3078_s0 + $0x90] sm:$0xff]  ;;  %v95_v47 = vld [vmem:[%s3079_s1 + $0xa0] sm:$0xff] }
  0x24   :  { %2330 = vmatprep.subr.mxu0 %v946_v38  ;;  %v54_v48 = vld [vmem:[%s3078_s0 + $0x98] sm:$0xff]  ;;  %v96_v49 = vld [vmem:[%s3079_s1 + $0xa8] sm:$0xff]  ;;  %v55_v50 = vld [vmem:[%s3078_s0 + $0xa0] sm:$0xff] }
  0x25   :  { %2291 = vmatmul.mubr.msk.f32.gmra.mxu1 %vm488_vm3, %v50_v39  ;;  %2331 = vmatpush3.msra.mxu0 %v946_v38  ;;  %v97_v51 = vld [vmem:[%s3079_s1 + $0xb0] sm:$0xff]  ;;  %v56_v52 = vld [vmem:[%s3078_s0 + $0xa8] sm:$0xff]  ;;  %v98_v53 = vld [vmem:[%s3079_s1 + $0xb8] sm:$0xff] }
  0x26   :  { %2233 = vmatmul.mubr.msk.f32.gmra.mxu0 %vm114_vm2, %v92_v40  ;;  %2293 = vmatprep.mubr.msk.f32.mxu1 %vm488_vm3, %v51_v41  ;;  %v57_v54 = vld [vmem:[%s3078_s0 + $0xb0] sm:$0xff]  ;;  %v99_v55 = vld [vmem:[%s3079_s1 + $0xc0] sm:$0xff]  ;;  %v58_v56 = vld [vmem:[%s3078_s0 + $0xb8] sm:$0xff] }
  0x27   :  { %2235 = vmatprep.mubr.msk.f32.mxu0 %vm114_vm2, %v93_v42  ;;  %2332 = vmatprep.subr.mxu0 %v945_v43  ;;  %v100_v57 = vld [vmem:[%s3079_s1 + $0xc8] sm:$0xff]  ;;  %v59_v58 = vld [vmem:[%s3078_s0 + $0xc0] sm:$0xff]  ;;  %v101_v59 = vld [vmem:[%s3079_s1 + $0xd0] sm:$0xff] }
  0x28   :  { %2333 = vmatpush3.msra.mxu0 %v945_v43  ;;  %v60_v60 = vld [vmem:[%s3078_s0 + $0xc8] sm:$0xff]  ;;  %v102_v61 = vld [vmem:[%s3079_s1 + $0xd8] sm:$0xff]  ;;  %v61_v62 = vld [vmem:[%s3078_s0 + $0xd0] sm:$0xff] }
  0x29   :  { %2294 = vmatmul.mubr.msk.f32.gmra.mxu1 %vm488_vm3, %v52_v44  ;;  %v103_v63 = vld [vmem:[%s3079_s1 + $0xe0] sm:$0xff]  ;;  %v62_v0 = vld [vmem:[%s3078_s0 + $0xd8] sm:$0xff]  ;;  %v104_v1 = vld [vmem:[%s3079_s1 + $0xe8] sm:$0xff] }
  0x2a   :  { %2236 = vmatmul.mubr.msk.f32.gmra.mxu0 %vm114_vm2, %v94_v45  ;;  %2296 = vmatprep.mubr.msk.f32.mxu1 %vm488_vm3, %v53_v46  ;;  %v63_v2 = vld [vmem:[%s3078_s0 + $0xe0] sm:$0xff]  ;;  %v105_v3 = vld [vmem:[%s3079_s1 + $0xf0] sm:$0xff]  ;;  %v64_v4 = vld [vmem:[%s3078_s0 + $0xe8] sm:$0xff] }
  0x2b   :  { %2238 = vmatprep.mubr.msk.f32.mxu0 %vm114_vm2, %v95_v47  ;;  %v106_v5 = vld [vmem:[%s3079_s1 + $0xf8] sm:$0xff]  ;;  %v65_v6 = vld [vmem:[%s3078_s0 + $0xf0] sm:$0xff]  ;;  %v107_v7 = vld [vmem:[%s3079_s1 + $0x100] sm:$0xff] }
  0x2c   :  { %v66_v8 = vld [vmem:[%s3078_s0 + $0xf8] sm:$0xff]  ;;  %v108_v9 = vld [vmem:[%s3079_s1 + $0x108] sm:$0xff]  ;;  %v67_v10 = vld [vmem:[%s3078_s0 + $0x100] sm:$0xff] }
  0x2d   :  { %2297 = vmatmul.mubr.msk.f32.gmra.mxu1 %vm488_vm3, %v54_v48  ;;  %v109_v11 = vld [vmem:[%s3079_s1 + $0x110] sm:$0xff]  ;;  %v68_v12 = vld [vmem:[%s3078_s0 + $0x108] sm:$0xff]  ;;  %v110_v14 = vld [vmem:[%s3079_s1 + $0x118] sm:$0xff] }
  0x2e   :  { %2239 = vmatmul.mubr.msk.f32.gmra.mxu0 %vm114_vm2, %v96_v49  ;;  %2299 = vmatprep.mubr.msk.f32.mxu1 %vm488_vm3, %v55_v50  ;;  %v69_v13 = vld [vmem:[%s3078_s0 + $0x110] sm:$0xff]  ;;  %v111_v15 = vld [vmem:[%s3079_s1 + $0x120] sm:$0xff]  ;;  %v70_v16 = vld [vmem:[%s3078_s0 + $0x118] sm:$0xff] }
  0x2f   :  { %2241 = vmatprep.mubr.msk.f32.mxu0 %vm114_vm2, %v97_v51  ;;  %v71_v17 = vld [vmem:[%s3078_s0 + $0x120] sm:$0xff]  ;;  %v112_v18 = vld [vmem:[%s3079_s1 + $0x128] sm:$0xff]  ;;  %v1367_v20 = vld [vmem:[%s3085_s7 + $0x18] sm:$0xff] }
  0x30   :  { %v72_v19 = vld [vmem:[%s3078_s0 + $0x128] sm:$0xff]  ;;  %v1366_v21 = vld [vmem:[%s3085_s7 + $0x10] sm:$0xff]  ;;  %2391 = vmatprep.subr.mxu1 %v1367_v20  ;;  %v1364_v23 = vld [vmem:[%s3085_s7] sm:$0xff] }
  0x31   :  { %2300 = vmatmul.mubr.msk.f32.gmra.mxu1 %vm488_vm3, %v56_v52  ;;  %v1365_v22 = vld [vmem:[%s3085_s7 + $0x8] sm:$0xff]  ;;  %v2876_v28 = vld [vmem:[%s3082_s4] ss:$0 sm:$0xff] }
  0x32   :  { %2242 = vmatmul.mubr.msk.f32.gmra.mxu0 %vm114_vm2, %v98_v53  ;;  %2302 = vmatprep.mubr.msk.f32.mxu1 %vm488_vm3, %v57_v54 }
  0x33   :  { %2244 = vmatprep.mubr.msk.f32.mxu0 %vm114_vm2, %v99_v55  ;;  %2392 = vmatpush3.msra.mxu1 %v1367_v20 }
  0x34   :  { %2393 = vmatprep.subr.mxu1 %v1366_v21 }
  0x35   :  { %2303 = vmatmul.mubr.msk.f32.gmra.mxu1 %vm488_vm3, %v58_v56 }
  0x36   :  { %2245 = vmatmul.mubr.msk.f32.gmra.mxu0 %vm114_vm2, %v100_v57  ;;  %2305 = vmatprep.mubr.msk.f32.mxu1 %vm488_vm3, %v59_v58 }
  0x37   :  { %2247 = vmatprep.mubr.msk.f32.mxu0 %vm114_vm2, %v101_v59  ;;  %2394 = vmatpush3.msra.mxu1 %v1366_v21 }
  0x38   :  { %2395 = vmatprep.subr.mxu1 %v1365_v22 }
  0x39   :  { %2306 = vmatmul.mubr.msk.f32.gmra.mxu1 %vm488_vm3, %v60_v60 }
  0x3a   :  { %2248 = vmatmul.mubr.msk.f32.gmra.mxu0 %vm114_vm2, %v102_v61  ;;  %2308 = vmatprep.mubr.msk.f32.mxu1 %vm488_vm3, %v61_v62 }
  0x3b   :  { %2250 = vmatprep.mubr.msk.f32.mxu0 %vm114_vm2, %v103_v63  ;;  %2396 = vmatpush3.msra.mxu1 %v1365_v22 }
  0x3c   :  { %2397 = vmatprep.subr.mxu1 %v1364_v23 }
  0x3d   :  { %2309 = vmatmul.mubr.msk.f32.gmra.mxu1 %vm488_vm3, %v62_v0 }
  0x3e   :  { %2251 = vmatmul.mubr.msk.f32.gmra.mxu0 %vm114_vm2, %v104_v1  ;;  %2311 = vmatprep.mubr.msk.f32.mxu1 %vm488_vm3, %v63_v2 }
  0x3f   :  { %2253 = vmatprep.mubr.msk.f32.mxu0 %vm114_vm2, %v105_v3  ;;  %2398 = vmatpush3.msra.mxu1 %v1364_v23 }
  0x41   :  { %2312 = vmatmul.mubr.msk.f32.gmra.mxu1 %vm488_vm3, %v64_v4 }
  0x42   :  { %2254 = vmatmul.mubr.msk.f32.gmra.mxu0 %vm114_vm2, %v106_v5  ;;  %2314 = vmatprep.mubr.msk.f32.mxu1 %vm488_vm3, %v65_v6 }
  0x43   :  { %2256 = vmatprep.mubr.msk.f32.mxu0 %vm114_vm2, %v107_v7 }
  0x45   :  { %2315 = vmatmul.mubr.msk.f32.gmra.mxu1 %vm488_vm3, %v66_v8 }
  0x46   :  { %2257 = vmatmul.mubr.msk.f32.gmra.mxu0 %vm114_vm2, %v108_v9  ;;  %2317 = vmatprep.mubr.msk.f32.mxu1 %vm488_vm3, %v67_v10 }
  0x47   :  { %2259 = vmatprep.mubr.msk.f32.mxu0 %vm114_vm2, %v109_v11 }
  0x49   :  { %2318 = vmatmul.mubr.msk.f32.gmra.mxu1 %vm488_vm3, %v68_v12 }
  0x4a   :  { %2320 = vmatprep.mubr.msk.f32.mxu1 %vm488_vm3, %v69_v13  ;;  %2260 = vmatmul.mubr.msk.f32.gmra.mxu0 %vm114_vm2, %v110_v14 }
  0x4b   :  { %2262 = vmatprep.mubr.msk.f32.mxu0 %vm114_vm2, %v111_v15 }
  0x4d   :  { %2321 = vmatmul.mubr.msk.f32.gmra.mxu1 %vm488_vm3, %v70_v16 }
  0x4e   :  { %2323 = vmatprep.mubr.msk.f32.mxu1 %vm488_vm3, %v71_v17  ;;  %2263 = vmatmul.mubr.msk.f32.gmra.mxu0 %vm114_vm2, %v112_v18 }
  0x51   :  { %2324 = vmatmul.mubr.msk.f32.gmra.mxu1 %vm488_vm3, %v72_v19 }
  0xc6   :  { %v2210_v24 = vpop.f32.mrf.mxu0 }
  0xc8   :  { %v299_v25 = vpop.f32.mrf.mxu0 }
  0xc9   :  { %v2271_v26 = vpop.f32.mrf.mxu1 }
  0xca   :  { %v679_v27 = vadd.f32 %v2271_v26, %v2210_v24  ;;  %v2213_v29 = vpop.f32.mrf.mxu0 }
  0xcb   :  { %v673_v30 = vpop.f32.mrf.mxu1 }
  0xcc   :  { %v674_v31 = vadd.f32 %v673_v30, %v299_v25  ;;  %v309_v32 = vpop.f32.mrf.mxu0  ;;  %v870_v33 = vadd.f32 %v2876_v28, %v679_v27 }
  0xcd   :  { %v2274_v34 = vpop.f32.mrf.mxu1 }
  0xce   :  { %v869_v35 = vadd.f32 %v2876_v28, %v674_v31  ;;  %v689_v36 = vadd.f32 %v2274_v34, %v2213_v29  ;;  %v2216_v37 = vpop.f32.mrf.mxu0  ;;  %v908_v42 = vmax.f32 %v870_v33, 0.0 }
  0xcf   :  { %v683_v38 = vpop.f32.mrf.mxu1 }
  0xd0   :  { %v907_v39 = vmax.f32 %v869_v35, 0.0  ;;  %v684_v40 = vadd.f32 %v683_v38, %v309_v32  ;;  %v319_v41 = vpop.f32.mrf.mxu0  ;;  %v872_v43 = vadd.f32 %v2876_v28, %v689_v36 }
  0xd1   :  { %v2277_v44 = vpop.f32.mrf.mxu1 }
  0xd2   :  { %v871_v45 = vadd.f32 %v2876_v28, %v684_v40  ;;  %v699_v46 = vadd.f32 %v2277_v44, %v2216_v37  ;;  %2334 = vmatprep.mubr.msk.f32.mxu0 %vm956_vm4, %v907_v39  ;;  %v2219_v47 = vpop.f32.mrf.mxu0  ;;  %v910_v52 = vmax.f32 %v872_v43, 0.0 }
  0xd3   :  { %v693_v48 = vpop.f32.mrf.mxu1  ;;  %2335 = vmatmul.mubr.msk.f32.vlgmr.msra.gmra.mxu0 %vm956_vm4, %v908_v42 }
  0xd4   :  { %v909_v49 = vmax.f32 %v871_v45, 0.0  ;;  %v694_v50 = vadd.f32 %v693_v48, %v319_v41  ;;  %v329_v51 = vpop.f32.mrf.mxu0  ;;  %v874_v53 = vadd.f32 %v2876_v28, %v699_v46 }
  0xd5   :  { %v2280_v54 = vpop.f32.mrf.mxu1 }
  0xd6   :  { %v873_v55 = vadd.f32 %v2876_v28, %v694_v50  ;;  %v709_v56 = vadd.f32 %v2280_v54, %v2219_v47  ;;  %2337 = vmatprep.mubr.msk.f32.mxu0 %vm956_vm4, %v909_v49  ;;  %v2222_v57 = vpop.f32.mrf.mxu0  ;;  %v912_v62 = vmax.f32 %v874_v53, 0.0 }
  0xd7   :  { %v703_v58 = vpop.f32.mrf.mxu1  ;;  %2338 = vmatmul.mubr.msk.f32.gmra.mxu0 %vm956_vm4, %v910_v52 }
  0xd8   :  { %v911_v59 = vmax.f32 %v873_v55, 0.0  ;;  %v704_v60 = vadd.f32 %v703_v58, %v329_v51  ;;  %v339_v61 = vpop.f32.mrf.mxu0  ;;  %v876_v63 = vadd.f32 %v2876_v28, %v709_v56 }
  0xd9   :  { %v2283_v0 = vpop.f32.mrf.mxu1 }
  0xda   :  { %v875_v1 = vadd.f32 %v2876_v28, %v704_v60  ;;  %v719_v2 = vadd.f32 %v2283_v0, %v2222_v57  ;;  %2340 = vmatprep.mubr.msk.f32.mxu0 %vm956_vm4, %v911_v59  ;;  %v2225_v3 = vpop.f32.mrf.mxu0  ;;  %v914_v8 = vmax.f32 %v876_v63, 0.0 }
  0xdb   :  { %v713_v4 = vpop.f32.mrf.mxu1  ;;  %2341 = vmatmul.mubr.msk.f32.gmra.mxu0 %vm956_vm4, %v912_v62 }
  0xdc   :  { %v913_v5 = vmax.f32 %v875_v1, 0.0  ;;  %v714_v6 = vadd.f32 %v713_v4, %v339_v61  ;;  %v349_v7 = vpop.f32.mrf.mxu0  ;;  %v878_v9 = vadd.f32 %v2876_v28, %v719_v2 }
  0xdd   :  { %v2286_v10 = vpop.f32.mrf.mxu1 }
  0xde   :  { %v877_v11 = vadd.f32 %v2876_v28, %v714_v6  ;;  %v729_v12 = vadd.f32 %v2286_v10, %v2225_v3  ;;  %2343 = vmatprep.mubr.msk.f32.mxu0 %vm956_vm4, %v913_v5  ;;  %v2228_v13 = vpop.f32.mrf.mxu0  ;;  %v916_v18 = vmax.f32 %v878_v9, 0.0 }
  0xdf   :  { %v723_v14 = vpop.f32.mrf.mxu1  ;;  %2344 = vmatmul.mubr.msk.f32.gmra.mxu0 %vm956_vm4, %v914_v8 }
  0xe0   :  { %v915_v15 = vmax.f32 %v877_v11, 0.0  ;;  %v724_v16 = vadd.f32 %v723_v14, %v349_v7  ;;  %v359_v17 = vpop.f32.mrf.mxu0  ;;  %v880_v19 = vadd.f32 %v2876_v28, %v729_v12 }
  0xe1   :  { %v2289_v20 = vpop.f32.mrf.mxu1 }
  0xe2   :  { %v879_v21 = vadd.f32 %v2876_v28, %v724_v16  ;;  %v739_v22 = vadd.f32 %v2289_v20, %v2228_v13  ;;  %2346 = vmatprep.mubr.msk.f32.mxu0 %vm956_vm4, %v915_v15  ;;  %v2231_v23 = vpop.f32.mrf.mxu0  ;;  %v918_v29 = vmax.f32 %v880_v19, 0.0 }
  0xe3   :  { %v733_v24 = vpop.f32.mrf.mxu1  ;;  %2347 = vmatmul.mubr.msk.f32.gmra.mxu0 %vm956_vm4, %v916_v18 }
  0xe4   :  { %v917_v25 = vmax.f32 %v879_v21, 0.0  ;;  %v734_v26 = vadd.f32 %v733_v24, %v359_v17  ;;  %v369_v27 = vpop.f32.mrf.mxu0  ;;  %v882_v30 = vadd.f32 %v2876_v28, %v739_v22 }
  0xe5   :  { %v2292_v31 = vpop.f32.mrf.mxu1 }
  0xe6   :  { %v881_v32 = vadd.f32 %v2876_v28, %v734_v26  ;;  %v749_v33 = vadd.f32 %v2292_v31, %v2231_v23  ;;  %2349 = vmatprep.mubr.msk.f32.mxu0 %vm956_vm4, %v917_v25  ;;  %v2234_v34 = vpop.f32.mrf.mxu0  ;;  %v920_v39 = vmax.f32 %v882_v30, 0.0 }
  0xe7   :  { %v743_v35 = vpop.f32.mrf.mxu1  ;;  %2350 = vmatmul.mubr.msk.f32.gmra.mxu0 %vm956_vm4, %v918_v29 }
  0xe8   :  { %v919_v36 = vmax.f32 %v881_v32, 0.0  ;;  %v744_v37 = vadd.f32 %v743_v35, %v369_v27  ;;  %v379_v38 = vpop.f32.mrf.mxu0  ;;  %v884_v40 = vadd.f32 %v2876_v28, %v749_v33 }
  0xe9   :  { %v2295_v41 = vpop.f32.mrf.mxu1 }
  0xea   :  { %v883_v42 = vadd.f32 %v2876_v28, %v744_v37  ;;  %v759_v43 = vadd.f32 %v2295_v41, %v2234_v34  ;;  %2352 = vmatprep.mubr.msk.f32.mxu0 %vm956_vm4, %v919_v36  ;;  %v2237_v44 = vpop.f32.mrf.mxu0  ;;  %v922_v49 = vmax.f32 %v884_v40, 0.0 }
  0xeb   :  { %v753_v45 = vpop.f32.mrf.mxu1  ;;  %2353 = vmatmul.mubr.msk.f32.gmra.mxu0 %vm956_vm4, %v920_v39 }
  0xec   :  { %v921_v46 = vmax.f32 %v883_v42, 0.0  ;;  %v754_v47 = vadd.f32 %v753_v45, %v379_v38  ;;  %v389_v48 = vpop.f32.mrf.mxu0  ;;  %v886_v50 = vadd.f32 %v2876_v28, %v759_v43 }
  0xed   :  { %v2298_v51 = vpop.f32.mrf.mxu1 }
  0xee   :  { %v885_v52 = vadd.f32 %v2876_v28, %v754_v47  ;;  %v769_v53 = vadd.f32 %v2298_v51, %v2237_v44  ;;  %2355 = vmatprep.mubr.msk.f32.mxu0 %vm956_vm4, %v921_v46  ;;  %v2240_v54 = vpop.f32.mrf.mxu0  ;;  %v924_v59 = vmax.f32 %v886_v50, 0.0 }
  0xef   :  { %v763_v55 = vpop.f32.mrf.mxu1  ;;  %2356 = vmatmul.mubr.msk.f32.gmra.mxu0 %vm956_vm4, %v922_v49 }
  0xf0   :  { %v923_v56 = vmax.f32 %v885_v52, 0.0  ;;  %v764_v57 = vadd.f32 %v763_v55, %v389_v48  ;;  %v399_v58 = vpop.f32.mrf.mxu0  ;;  %v888_v60 = vadd.f32 %v2876_v28, %v769_v53 }
  0xf1   :  { %v2301_v61 = vpop.f32.mrf.mxu1 }
  0xf2   :  { %v887_v62 = vadd.f32 %v2876_v28, %v764_v57  ;;  %v779_v63 = vadd.f32 %v2301_v61, %v2240_v54  ;;  %2358 = vmatprep.mubr.msk.f32.mxu0 %vm956_vm4, %v923_v56  ;;  %v2243_v0 = vpop.f32.mrf.mxu0  ;;  %v926_v5 = vmax.f32 %v888_v60, 0.0 }
  0xf3   :  { %v773_v1 = vpop.f32.mrf.mxu1  ;;  %2359 = vmatmul.mubr.msk.f32.gmra.mxu0 %vm956_vm4, %v924_v59 }
  0xf4   :  { %v925_v2 = vmax.f32 %v887_v62, 0.0  ;;  %v774_v3 = vadd.f32 %v773_v1, %v399_v58  ;;  %v409_v4 = vpop.f32.mrf.mxu0  ;;  %v890_v6 = vadd.f32 %v2876_v28, %v779_v63 }
  0xf5   :  { %v2304_v7 = vpop.f32.mrf.mxu1 }
  0xf6   :  { %v889_v8 = vadd.f32 %v2876_v28, %v774_v3  ;;  %v789_v9 = vadd.f32 %v2304_v7, %v2243_v0  ;;  %2361 = vmatprep.mubr.msk.f32.mxu0 %vm956_vm4, %v925_v2  ;;  %v2246_v10 = vpop.f32.mrf.mxu0  ;;  %v928_v15 = vmax.f32 %v890_v6, 0.0 }
  0xf7   :  { %v783_v11 = vpop.f32.mrf.mxu1  ;;  %2362 = vmatmul.mubr.msk.f32.gmra.mxu0 %vm956_vm4, %v926_v5 }
  0xf8   :  { %v927_v12 = vmax.f32 %v889_v8, 0.0  ;;  %v784_v13 = vadd.f32 %v783_v11, %v409_v4  ;;  %v419_v14 = vpop.f32.mrf.mxu0  ;;  %v892_v16 = vadd.f32 %v2876_v28, %v789_v9 }
  0xf9   :  { %v2307_v17 = vpop.f32.mrf.mxu1 }
  0xfa   :  { %v891_v18 = vadd.f32 %v2876_v28, %v784_v13  ;;  %v799_v19 = vadd.f32 %v2307_v17, %v2246_v10  ;;  %2364 = vmatprep.mubr.msk.f32.mxu0 %vm956_vm4, %v927_v12  ;;  %v2249_v20 = vpop.f32.mrf.mxu0  ;;  %v930_v25 = vmax.f32 %v892_v16, 0.0 }
  0xfb   :  { %v793_v21 = vpop.f32.mrf.mxu1  ;;  %2365 = vmatmul.mubr.msk.f32.gmra.mxu0 %vm956_vm4, %v928_v15 }
  0xfc   :  { %v929_v22 = vmax.f32 %v891_v18, 0.0  ;;  %v794_v23 = vadd.f32 %v793_v21, %v419_v14  ;;  %v429_v24 = vpop.f32.mrf.mxu0  ;;  %v894_v26 = vadd.f32 %v2876_v28, %v799_v19 }
  0xfd   :  { %v2310_v27 = vpop.f32.mrf.mxu1 }
  0xfe   :  { %v893_v29 = vadd.f32 %v2876_v28, %v794_v23  ;;  %v809_v30 = vadd.f32 %v2310_v27, %v2249_v20  ;;  %2367 = vmatprep.mubr.msk.f32.mxu0 %vm956_vm4, %v929_v22  ;;  %v2252_v31 = vpop.f32.mrf.mxu0  ;;  %v932_v36 = vmax.f32 %v894_v26, 0.0 }
  0xff   :  { %v803_v32 = vpop.f32.mrf.mxu1  ;;  %2368 = vmatmul.mubr.msk.f32.gmra.mxu0 %vm956_vm4, %v930_v25  ;;  %v2957_v25 = vld [vmem:[%s3084_s6] ss:$0 sm:$0xff]  ;;  %s2482_s6 = smov [#allocation3]  }
 0x100   :  { %v931_v33 = vmax.f32 %v893_v29, 0.0  ;;  %v804_v34 = vadd.f32 %v803_v32, %v429_v24  ;;  %v439_v35 = vpop.f32.mrf.mxu0  ;;  %v896_v37 = vadd.f32 %v2876_v28, %v809_v30  ;;  %s1878_s13 = sshll.u32 %s2482_s6, 4  ;;  %s1879_s13 = int_to_ptr.vmem [resolvable:$true] %s1878_s13 }
 0x101   :  { %v2313_v38 = vpop.f32.mrf.mxu1  ;;  %s2459_s14 = scalar_lea.vmem %s1879_s13, 48  ;;  %s2463_s15 = scalar_lea.vmem %s1879_s13, 64 }
 0x102   :  { %v895_v39 = vadd.f32 %v2876_v28, %v804_v34  ;;  %v819_v40 = vadd.f32 %v2313_v38, %v2252_v31  ;;  %2370 = vmatprep.mubr.msk.f32.mxu0 %vm956_vm4, %v931_v33  ;;  %v2255_v41 = vpop.f32.mrf.mxu0  ;;  %v934_v46 = vmax.f32 %v896_v37, 0.0  ;;  %p2460_p0 = scmp.ne.s32.totalorder %s1879_s13, %s2459_s14  ;;  %p2464_p1 = scmp.lt.s32.totalorder %s1879_s13, %s1879_s13 }
 0x103   :  { %v813_v42 = vpop.f32.mrf.mxu1  ;;  %2371 = vmatmul.mubr.msk.f32.gmra.mxu0 %vm956_vm4, %v932_v36  ;;  %p2465_p2 = scmp.lt.s32.totalorder %s2463_s15, %s2459_s14 }
 0x104   :  { %v933_v43 = vmax.f32 %v895_v39, 0.0  ;;  %v814_v44 = vadd.f32 %v813_v42, %v439_v35  ;;  %v449_v45 = vpop.f32.mrf.mxu0  ;;  %v898_v47 = vadd.f32 %v2876_v28, %v819_v40 }
 0x105   :  { %v2316_v48 = vpop.f32.mrf.mxu1  ;;  %p2466_p3 = por %p2465_p2, %p2464_p1 }
 0x106   :  { %v897_v49 = vadd.f32 %v2876_v28, %v814_v44  ;;  %v829_v50 = vadd.f32 %v2316_v48, %v2255_v41  ;;  %2373 = vmatprep.mubr.msk.f32.mxu0 %vm956_vm4, %v933_v43  ;;  %v2258_v51 = vpop.f32.mrf.mxu0  ;;  %v936_v56 = vmax.f32 %v898_v47, 0.0 }
 0x107   :  { %v823_v52 = vpop.f32.mrf.mxu1  ;;  %2374 = vmatmul.mubr.msk.f32.gmra.mxu0 %vm956_vm4, %v934_v46  ;;  %p2467_p4 = pnand %p2466_p3, %p2460_p0 }
 0x108   :  { %v935_v53 = vmax.f32 %v897_v49, 0.0  ;;  %v824_v54 = vadd.f32 %v823_v52, %v449_v45  ;;  %v459_v55 = vpop.f32.mrf.mxu0  ;;  %v900_v57 = vadd.f32 %v2876_v28, %v829_v50 }
 0x109   :  { %v2319_v58 = vpop.f32.mrf.mxu1 }
 0x10a   :  { %v899_v59 = vadd.f32 %v2876_v28, %v824_v54  ;;  %v839_v60 = vadd.f32 %v2319_v58, %v2258_v51  ;;  %2376 = vmatprep.mubr.msk.f32.mxu0 %vm956_vm4, %v935_v53  ;;  %v2261_v61 = vpop.f32.mrf.mxu0  ;;  %v938_v2 = vmax.f32 %v900_v57, 0.0 }
 0x10b   :  { %v833_v62 = vpop.f32.mrf.mxu1  ;;  %2377 = vmatmul.mubr.msk.f32.gmra.mxu0 %vm956_vm4, %v936_v56 }
 0x10c   :  { %v937_v63 = vmax.f32 %v899_v59, 0.0  ;;  %v834_v0 = vadd.f32 %v833_v62, %v459_v55  ;;  %v469_v1 = vpop.f32.mrf.mxu0  ;;  %v902_v3 = vadd.f32 %v2876_v28, %v839_v60 }
 0x10d   :  { %v2322_v4 = vpop.f32.mrf.mxu1 }
 0x10e   :  { %v901_v5 = vadd.f32 %v2876_v28, %v834_v0  ;;  %v849_v6 = vadd.f32 %v2322_v4, %v2261_v61  ;;  %2379 = vmatprep.mubr.msk.f32.mxu0 %vm956_vm4, %v937_v63  ;;  %v2264_v7 = vpop.f32.mrf.mxu0  ;;  %v940_v12 = vmax.f32 %v902_v3, 0.0 }
 0x10f   :  { %v843_v8 = vpop.f32.mrf.mxu1  ;;  %2380 = vmatmul.mubr.msk.f32.gmra.mxu0 %vm956_vm4, %v938_v2 }
 0x110   :  { %v939_v9 = vmax.f32 %v901_v5, 0.0  ;;  %v904_v10 = vadd.f32 %v2876_v28, %v849_v6  ;;  %v844_v11 = vadd.f32 %v843_v8, %v469_v1  ;;  %v479_v14 = vpop.f32.mrf.mxu0 }
 0x111   :  { %v2325_v13 = vpop.f32.mrf.mxu1 }
 0x112   :  { %v903_v15 = vadd.f32 %v2876_v28, %v844_v11  ;;  %v859_v16 = vadd.f32 %v2325_v13, %v2264_v7  ;;  %2382 = vmatprep.mubr.msk.f32.mxu0 %vm956_vm4, %v939_v9  ;;  %v942_v17 = vmax.f32 %v904_v10, 0.0 }
 0x113   :  { %v853_v18 = vpop.f32.mrf.mxu1  ;;  %2383 = vmatmul.mubr.msk.f32.gmra.mxu0 %vm956_vm4, %v940_v12 }
 0x114   :  { %v941_v19 = vmax.f32 %v903_v15, 0.0  ;;  %v906_v20 = vadd.f32 %v2876_v28, %v859_v16  ;;  %v854_v21 = vadd.f32 %v853_v18, %v479_v14 }
 0x116   :  { %v905_v22 = vadd.f32 %v2876_v28, %v854_v21  ;;  %2385 = vmatprep.mubr.msk.f32.mxu0 %vm956_vm4, %v941_v19  ;;  %v944_v23 = vmax.f32 %v906_v20, 0.0 }
 0x117   :  { %2386 = vmatmul.mubr.msk.f32.gmra.mxu0 %vm956_vm4, %v942_v17 }
 0x118   :  { %v943_v24 = vmax.f32 %v905_v22, 0.0 }
 0x11a   :  { %2388 = vmatprep.mubr.msk.f32.mxu0 %vm956_vm4, %v943_v24 }
 0x11b   :  { %2389 = vmatmul.mubr.msk.f32.gmra.mxu0 %vm956_vm4, %v944_v23 }
 0x193   :  { %v2336_v26 = vpop.f32.mrf.mxu0 }
 0x194   :  { %v1143_v27 = vadd.f32 %v2336_v26, %v2957_v25 }
 0x195   :  { %v1137_v29 = vpop.f32.mrf.mxu0 }
 0x196   :  { %v1138_v28 = vadd.f32 %v2957_v25, %v1137_v29  ;;  %v1327_v32 = vmax.f32 %v1143_v27, 0.0 }
 0x197   :  { %v2339_v30 = vpop.f32.mrf.mxu0 }
 0x198   :  { %v1326_v31 = vmax.f32 %v1138_v28, 0.0  ;;  %v1153_v33 = vadd.f32 %v2339_v30, %v2957_v25 }
 0x199   :  { %v1147_v34 = vpop.f32.mrf.mxu0 }
 0x19a   :  { %v1148_v35 = vadd.f32 %v2957_v25, %v1147_v34  ;;  %2399 = vmatprep.mubr.msk.f32.mxu1 %vm956_vm4, %v1326_v31  ;;  %v1329_v38 = vmax.f32 %v1153_v33, 0.0 }
 0x19b   :  { %v2342_v36 = vpop.f32.mrf.mxu0  ;;  %2400 = vmatmul.mubr.msk.f32.vlgmr.msra.gmra.mxu1 %vm956_vm4, %v1327_v32 }
 0x19c   :  { %v1328_v37 = vmax.f32 %v1148_v35, 0.0  ;;  %v1163_v39 = vadd.f32 %v2342_v36, %v2957_v25 }
 0x19d   :  { %v1157_v40 = vpop.f32.mrf.mxu0 }
 0x19e   :  { %v1158_v41 = vadd.f32 %v2957_v25, %v1157_v40  ;;  %2402 = vmatprep.mubr.msk.f32.mxu1 %vm956_vm4, %v1328_v37  ;;  %v1331_v44 = vmax.f32 %v1163_v39, 0.0 }
 0x19f   :  { %v2345_v42 = vpop.f32.mrf.mxu0  ;;  %2403 = vmatmul.mubr.msk.f32.gmra.mxu1 %vm956_vm4, %v1329_v38 }
 0x1a0   :  { %v1330_v43 = vmax.f32 %v1158_v41, 0.0  ;;  %v1173_v45 = vadd.f32 %v2345_v42, %v2957_v25 }
 0x1a1   :  { %v1167_v46 = vpop.f32.mrf.mxu0 }
 0x1a2   :  { %v1168_v47 = vadd.f32 %v2957_v25, %v1167_v46  ;;  %2405 = vmatprep.mubr.msk.f32.mxu1 %vm956_vm4, %v1330_v43  ;;  %v1333_v50 = vmax.f32 %v1173_v45, 0.0 }
 0x1a3   :  { %v2348_v48 = vpop.f32.mrf.mxu0  ;;  %2406 = vmatmul.mubr.msk.f32.gmra.mxu1 %vm956_vm4, %v1331_v44 }
 0x1a4   :  { %v1332_v49 = vmax.f32 %v1168_v47, 0.0  ;;  %v1183_v51 = vadd.f32 %v2348_v48, %v2957_v25 }
 0x1a5   :  { %v1177_v52 = vpop.f32.mrf.mxu0 }
 0x1a6   :  { %v1178_v53 = vadd.f32 %v2957_v25, %v1177_v52  ;;  %2408 = vmatprep.mubr.msk.f32.mxu1 %vm956_vm4, %v1332_v49  ;;  %v1335_v56 = vmax.f32 %v1183_v51, 0.0 }
 0x1a7   :  { %v2351_v54 = vpop.f32.mrf.mxu0  ;;  %2409 = vmatmul.mubr.msk.f32.gmra.mxu1 %vm956_vm4, %v1333_v50 }
 0x1a8   :  { %v1334_v55 = vmax.f32 %v1178_v53, 0.0  ;;  %v1193_v57 = vadd.f32 %v2351_v54, %v2957_v25 }
 0x1a9   :  { %v1187_v58 = vpop.f32.mrf.mxu0 }
 0x1aa   :  { %v1188_v59 = vadd.f32 %v2957_v25, %v1187_v58  ;;  %2411 = vmatprep.mubr.msk.f32.mxu1 %vm956_vm4, %v1334_v55  ;;  %v1337_v62 = vmax.f32 %v1193_v57, 0.0 }
 0x1ab   :  { %v2354_v60 = vpop.f32.mrf.mxu0  ;;  %2412 = vmatmul.mubr.msk.f32.gmra.mxu1 %vm956_vm4, %v1335_v56 }
 0x1ac   :  { %v1336_v61 = vmax.f32 %v1188_v59, 0.0  ;;  %v1203_v63 = vadd.f32 %v2354_v60, %v2957_v25 }
 0x1ad   :  { %v1197_v0 = vpop.f32.mrf.mxu0 }
 0x1ae   :  { %v1198_v1 = vadd.f32 %v2957_v25, %v1197_v0  ;;  %2414 = vmatprep.mubr.msk.f32.mxu1 %vm956_vm4, %v1336_v61  ;;  %v1339_v4 = vmax.f32 %v1203_v63, 0.0 }
 0x1af   :  { %v2357_v2 = vpop.f32.mrf.mxu0  ;;  %2415 = vmatmul.mubr.msk.f32.gmra.mxu1 %vm956_vm4, %v1337_v62 }
 0x1b0   :  { %v1338_v3 = vmax.f32 %v1198_v1, 0.0  ;;  %v1213_v5 = vadd.f32 %v2357_v2, %v2957_v25 }
 0x1b1   :  { %v1207_v6 = vpop.f32.mrf.mxu0 }
 0x1b2   :  { %v1208_v7 = vadd.f32 %v2957_v25, %v1207_v6  ;;  %2417 = vmatprep.mubr.msk.f32.mxu1 %vm956_vm4, %v1338_v3  ;;  %v1341_v10 = vmax.f32 %v1213_v5, 0.0 }
 0x1b3   :  { %v2360_v8 = vpop.f32.mrf.mxu0  ;;  %2418 = vmatmul.mubr.msk.f32.gmra.mxu1 %vm956_vm4, %v1339_v4 }
 0x1b4   :  { %v1340_v9 = vmax.f32 %v1208_v7, 0.0  ;;  %v1223_v11 = vadd.f32 %v2360_v8, %v2957_v25 }
 0x1b5   :  { %v1217_v12 = vpop.f32.mrf.mxu0 }
 0x1b6   :  { %v1218_v13 = vadd.f32 %v2957_v25, %v1217_v12  ;;  %2420 = vmatprep.mubr.msk.f32.mxu1 %vm956_vm4, %v1340_v9  ;;  %v1343_v16 = vmax.f32 %v1223_v11, 0.0 }
 0x1b7   :  { %v2363_v14 = vpop.f32.mrf.mxu0  ;;  %2421 = vmatmul.mubr.msk.f32.gmra.mxu1 %vm956_vm4, %v1341_v10 }
 0x1b8   :  { %v1342_v15 = vmax.f32 %v1218_v13, 0.0  ;;  %v1233_v17 = vadd.f32 %v2363_v14, %v2957_v25  ;;  %v3035_v14 = vld [vmem:[#allocation2] ss:$0 sm:$0xff] }
 0x1b9   :  { %v1227_v18 = vpop.f32.mrf.mxu0 }
 0x1ba   :  { %v1228_v19 = vadd.f32 %v2957_v25, %v1227_v18  ;;  %2423 = vmatprep.mubr.msk.f32.mxu1 %vm956_vm4, %v1342_v15  ;;  %v1345_v22 = vmax.f32 %v1233_v17, 0.0 }
 0x1bb   :  { %v2366_v20 = vpop.f32.mrf.mxu0  ;;  %2424 = vmatmul.mubr.msk.f32.gmra.mxu1 %vm956_vm4, %v1343_v16 }
 0x1bc   :  { %v1344_v21 = vmax.f32 %v1228_v19, 0.0  ;;  %v1243_v23 = vadd.f32 %v2366_v20, %v2957_v25 }
 0x1bd   :  { %v1237_v24 = vpop.f32.mrf.mxu0 }
 0x1be   :  { %v1238_v26 = vadd.f32 %v2957_v25, %v1237_v24  ;;  %2426 = vmatprep.mubr.msk.f32.mxu1 %vm956_vm4, %v1344_v21  ;;  %v1347_v28 = vmax.f32 %v1243_v23, 0.0 }
 0x1bf   :  { %v2369_v27 = vpop.f32.mrf.mxu0  ;;  %2427 = vmatmul.mubr.msk.f32.gmra.mxu1 %vm956_vm4, %v1345_v22 }
 0x1c0   :  { %v1346_v29 = vmax.f32 %v1238_v26, 0.0  ;;  %v1253_v30 = vadd.f32 %v2369_v27, %v2957_v25 }
 0x1c1   :  { %v1247_v31 = vpop.f32.mrf.mxu0 }
 0x1c2   :  { %v1248_v32 = vadd.f32 %v2957_v25, %v1247_v31  ;;  %2429 = vmatprep.mubr.msk.f32.mxu1 %vm956_vm4, %v1346_v29  ;;  %v1349_v35 = vmax.f32 %v1253_v30, 0.0 }
 0x1c3   :  { %v2372_v33 = vpop.f32.mrf.mxu0  ;;  %2430 = vmatmul.mubr.msk.f32.gmra.mxu1 %vm956_vm4, %v1347_v28 }
 0x1c4   :  { %v1348_v34 = vmax.f32 %v1248_v32, 0.0  ;;  %v1263_v36 = vadd.f32 %v2372_v33, %v2957_v25 }
 0x1c5   :  { %v1257_v37 = vpop.f32.mrf.mxu0 }
 0x1c6   :  { %v1258_v38 = vadd.f32 %v2957_v25, %v1257_v37  ;;  %2432 = vmatprep.mubr.msk.f32.mxu1 %vm956_vm4, %v1348_v34  ;;  %v1351_v41 = vmax.f32 %v1263_v36, 0.0 }
 0x1c7   :  { %v2375_v39 = vpop.f32.mrf.mxu0  ;;  %2433 = vmatmul.mubr.msk.f32.gmra.mxu1 %vm956_vm4, %v1349_v35 }
 0x1c8   :  { %v1350_v40 = vmax.f32 %v1258_v38, 0.0  ;;  %v1273_v42 = vadd.f32 %v2375_v39, %v2957_v25 }
 0x1c9   :  { %v1267_v43 = vpop.f32.mrf.mxu0 }
 0x1ca   :  { %v1268_v44 = vadd.f32 %v2957_v25, %v1267_v43  ;;  %2435 = vmatprep.mubr.msk.f32.mxu1 %vm956_vm4, %v1350_v40  ;;  %v1353_v47 = vmax.f32 %v1273_v42, 0.0 }
 0x1cb   :  { %v2378_v45 = vpop.f32.mrf.mxu0  ;;  %2436 = vmatmul.mubr.msk.f32.gmra.mxu1 %vm956_vm4, %v1351_v41 }
 0x1cc   :  { %v1352_v46 = vmax.f32 %v1268_v44, 0.0  ;;  %v1283_v48 = vadd.f32 %v2378_v45, %v2957_v25 }
 0x1cd   :  { %v1277_v49 = vpop.f32.mrf.mxu0 }
 0x1ce   :  { %v1278_v50 = vadd.f32 %v2957_v25, %v1277_v49  ;;  %2438 = vmatprep.mubr.msk.f32.mxu1 %vm956_vm4, %v1352_v46  ;;  %v1355_v53 = vmax.f32 %v1283_v48, 0.0 }
 0x1cf   :  { %v2381_v51 = vpop.f32.mrf.mxu0  ;;  %2439 = vmatmul.mubr.msk.f32.gmra.mxu1 %vm956_vm4, %v1353_v47 }
 0x1d0   :  { %v1354_v52 = vmax.f32 %v1278_v50, 0.0  ;;  %v1293_v54 = vadd.f32 %v2381_v51, %v2957_v25 }
 0x1d1   :  { %v1287_v55 = vpop.f32.mrf.mxu0 }
 0x1d2   :  { %v1288_v56 = vadd.f32 %v2957_v25, %v1287_v55  ;;  %2441 = vmatprep.mubr.msk.f32.mxu1 %vm956_vm4, %v1354_v52  ;;  %v1357_v59 = vmax.f32 %v1293_v54, 0.0 }
 0x1d3   :  { %v2384_v57 = vpop.f32.mrf.mxu0  ;;  %2442 = vmatmul.mubr.msk.f32.gmra.mxu1 %vm956_vm4, %v1355_v53 }
 0x1d4   :  { %v1356_v58 = vmax.f32 %v1288_v56, 0.0  ;;  %v1303_v60 = vadd.f32 %v2384_v57, %v2957_v25 }
 0x1d5   :  { %v1297_v61 = vpop.f32.mrf.mxu0 }
 0x1d6   :  { %v1298_v62 = vadd.f32 %v2957_v25, %v1297_v61  ;;  %2444 = vmatprep.mubr.msk.f32.mxu1 %vm956_vm4, %v1356_v58  ;;  %v1359_v1 = vmax.f32 %v1303_v60, 0.0 }
 0x1d7   :  { %v2387_v63 = vpop.f32.mrf.mxu0  ;;  %2445 = vmatmul.mubr.msk.f32.gmra.mxu1 %vm956_vm4, %v1357_v59 }
 0x1d8   :  { %v1358_v0 = vmax.f32 %v1298_v62, 0.0  ;;  %v1313_v2 = vadd.f32 %v2387_v63, %v2957_v25 }
 0x1d9   :  { %v1307_v3 = vpop.f32.mrf.mxu0 }
 0x1da   :  { %v1308_v4 = vadd.f32 %v2957_v25, %v1307_v3  ;;  %2447 = vmatprep.mubr.msk.f32.mxu1 %vm956_vm4, %v1358_v0  ;;  %v1361_v8 = vmax.f32 %v1313_v2, 0.0 }
 0x1db   :  { %v2390_v5 = vpop.f32.mrf.mxu0  ;;  %2448 = vmatmul.mubr.msk.f32.gmra.mxu1 %vm956_vm4, %v1359_v1 }
 0x1dc   :  { %v1360_v6 = vmax.f32 %v1308_v4, 0.0  ;;  %v1323_v7 = vadd.f32 %v2390_v5, %v2957_v25 }
 0x1dd   :  { %v1317_v9 = vpop.f32.mrf.mxu0 }
 0x1de   :  { %v1318_v10 = vadd.f32 %v2957_v25, %v1317_v9  ;;  %2450 = vmatprep.mubr.msk.f32.mxu1 %vm956_vm4, %v1360_v6  ;;  %v1363_v11 = vmax.f32 %v1323_v7, 0.0 }
 0x1df   :  { %2451 = vmatmul.mubr.msk.f32.gmra.mxu1 %vm956_vm4, %v1361_v8 }
 0x1e0   :  { %v1362_v12 = vmax.f32 %v1318_v10, 0.0 }
 0x1e2   :  { %2453 = vmatprep.mubr.msk.f32.mxu1 %vm956_vm4, %v1362_v12 }
 0x1e3   :  { %2454 = vmatmul.mubr.msk.f32.gmra.mxu1 %vm956_vm4, %v1363_v11 }
 0x25b   :  { %v2401_v13 = vpop.f32.mrf.mxu1 }
 0x25c   :  { %v1561_v25 = vadd.f32 %v2401_v13, %v3035_v14 }
 0x25d   :  { %v1555_v15 = vpop.f32.mrf.mxu1 }
 0x25e   :  { %v1556_v16 = vadd.f32 %v3035_v14, %v1555_v15 }
 0x25f   :  { %v2404_v17 = vpop.f32.mrf.mxu1 }
 0x260   :  { %1744 = vxpose.xlu0.b32.start [1/16] (narrow) %v1556_v16, 8  ;;  %v1571_v24 = vadd.f32 %v2404_v17, %v3035_v14 }
 0x261   :  { %v1565_v18 = vpop.f32.mrf.mxu1 }
 0x262   :  { %v1566_v21 = vadd.f32 %v3035_v14, %v1565_v18 }
 0x263   :  { %v2407_v19 = vpop.f32.mrf.mxu1 }
 0x264   :  { %1745 = vxpose.xlu0.b32.cont [2/16] (narrow) %v1561_v25, 8  ;;  %v1581_v31 = vadd.f32 %v2407_v19, %v3035_v14 }
 0x265   :  { %v1575_v20 = vpop.f32.mrf.mxu1 }
 0x266   :  { %v1576_v29 = vadd.f32 %v3035_v14, %v1575_v20 }
 0x267   :  { %v2410_v22 = vpop.f32.mrf.mxu1 }
 0x268   :  { %1746 = vxpose.xlu0.b32.cont [3/16] (narrow) %v1566_v21, 8  ;;  %v1591_v37 = vadd.f32 %v2410_v22, %v3035_v14 }
 0x269   :  { %v1585_v23 = vpop.f32.mrf.mxu1 }
 0x26a   :  { %v1586_v34 = vadd.f32 %v3035_v14, %v1585_v23 }
 0x26b   :  { %v2413_v26 = vpop.f32.mrf.mxu1 }
 0x26c   :  { %1747 = vxpose.xlu0.b32.cont [4/16] (narrow) %v1571_v24, 8  ;;  %v1601_v44 = vadd.f32 %v2413_v26, %v3035_v14 }
 0x26d   :  { %v1595_v27 = vpop.f32.mrf.mxu1 }
 0x26e   :  { %v1596_v40 = vadd.f32 %v3035_v14, %v1595_v27  ;;  %v2481_v27 = vmov 1966171168  }
 0x26f   :  { %v2416_v28 = vpop.f32.mrf.mxu1 }
 0x270   :  { %1748 = vxpose.xlu0.b32.cont [5/16] (narrow) %v1576_v29, 8  ;;  %v1611_v52 = vadd.f32 %v2416_v28, %v3035_v14  ;;  %v1845_v29 = vunpack.c.l.s4 %v2481_v27  ;;  %v1847_v28 = vlaneseq }
 0x271   :  { %v1605_v30 = vpop.f32.mrf.mxu1 }
 0x272   :  { %v1606_v48 = vadd.f32 %v3035_v14, %v1605_v30  ;;  %v1846_v30 = vunpack.c.0.s8 %v1845_v29  ;;  %vm1869_vm5 = vcmp.lt.s32.totalorder %v1847_v28, 304 }
 0x273   :  { %v2419_v32 = vpop.f32.mrf.mxu1 }
 0x274   :  { %1749 = vxpose.xlu0.b32.cont [6/16] (narrow) %v1581_v31, 8  ;;  %v1621_v60 = vadd.f32 %v2419_v32, %v3035_v14  ;;  %v1848_v31 = vshrl.u32 %v1847_v28, 7 }
 0x275   :  { %v1615_v33 = vpop.f32.mrf.mxu1 }
 0x276   :  { %v1616_v56 = vadd.f32 %v3035_v14, %v1615_v33 }
 0x277   :  { %v2422_v35 = vpop.f32.mrf.mxu1 }
 0x278   :  { %1750 = vxpose.xlu0.b32.cont [7/16] (narrow) %v1586_v34, 8  ;;  %v1631_v4 = vadd.f32 %v2422_v35, %v3035_v14  ;;  %v1849_v34 = vsub.s32 %v1846_v30, %v1848_v31 }
 0x279   :  { %v1625_v36 = vpop.f32.mrf.mxu1 }
 0x27a   :  { %v1626_v0 = vadd.f32 %v3035_v14, %v1625_v36 }
 0x27b   :  { %v2425_v38 = vpop.f32.mrf.mxu1 }
 0x27c   :  { %1751 = vxpose.xlu0.b32.cont [8/16] (narrow) %v1591_v37, 8  ;;  %v1641_v45 = vadd.f32 %v2425_v38, %v3035_v14 }
 0x27d   :  { %v1635_v39 = vpop.f32.mrf.mxu1 }
 0x27e   :  { %v1636_v41 = vadd.f32 %v3035_v14, %v1635_v39 }
 0x27f   :  { %v2428_v42 = vpop.f32.mrf.mxu1 }
 0x280   :  { %1776 = vxpose.xlu1.b32.start [1/16] (narrow) %v1636_v41, 8  ;;  %1752 = vxpose.xlu0.b32.cont [9/16] (narrow) %v1596_v40, 8  ;;  %v1651_v53 = vadd.f32 %v2428_v42, %v3035_v14 }
 0x281   :  { %v1645_v43 = vpop.f32.mrf.mxu1 }
 0x282   :  { %v1646_v49 = vadd.f32 %v3035_v14, %v1645_v43 }
 0x283   :  { %v2431_v46 = vpop.f32.mrf.mxu1 }
 0x284   :  { %1777 = vxpose.xlu1.b32.cont [2/16] (narrow) %v1641_v45, 8  ;;  %1753 = vxpose.xlu0.b32.cont [10/16] (narrow) %v1601_v44, 8  ;;  %v1661_v61 = vadd.f32 %v2431_v46, %v3035_v14 }
 0x285   :  { %v1655_v47 = vpop.f32.mrf.mxu1 }
 0x286   :  { %v1656_v57 = vadd.f32 %v3035_v14, %v1655_v47 }
 0x287   :  { %v2434_v50 = vpop.f32.mrf.mxu1 }
 0x288   :  { %1778 = vxpose.xlu1.b32.cont [3/16] (narrow) %v1646_v49, 8  ;;  %1754 = vxpose.xlu0.b32.cont [11/16] (narrow) %v1606_v48, 8  ;;  %v1671_v5 = vadd.f32 %v2434_v50, %v3035_v14 }
 0x289   :  { %v1665_v51 = vpop.f32.mrf.mxu1 }
 0x28a   :  { %v1666_v1 = vadd.f32 %v3035_v14, %v1665_v51 }
 0x28b   :  { %v2437_v54 = vpop.f32.mrf.mxu1 }
 0x28c   :  { %1779 = vxpose.xlu1.b32.cont [4/16] (narrow) %v1651_v53, 8  ;;  %1755 = vxpose.xlu0.b32.cont [12/16] (narrow) %v1611_v52, 8  ;;  %v1681_v11 = vadd.f32 %v2437_v54, %v3035_v14 }
 0x28d   :  { %v1675_v55 = vpop.f32.mrf.mxu1 }
 0x28e   :  { %v1676_v8 = vadd.f32 %v3035_v14, %v1675_v55 }
 0x28f   :  { %v2440_v58 = vpop.f32.mrf.mxu1 }
 0x290   :  { %1780 = vxpose.xlu1.b32.cont [5/16] (narrow) %v1656_v57, 8  ;;  %1756 = vxpose.xlu0.b32.cont [13/16] (narrow) %v1616_v56, 8  ;;  %v1691_v18 = vadd.f32 %v2440_v58, %v3035_v14 }
 0x291   :  { %v1685_v59 = vpop.f32.mrf.mxu1 }
 0x292   :  { %v1686_v15 = vadd.f32 %v3035_v14, %v1685_v59 }
 0x293   :  { %v2443_v62 = vpop.f32.mrf.mxu1 }
 0x294   :  { %1781 = vxpose.xlu1.b32.cont [6/16] (narrow) %v1661_v61, 8  ;;  %1757 = vxpose.xlu0.b32.cont [14/16] (narrow) %v1621_v60, 8  ;;  %v1701_v22 = vadd.f32 %v2443_v62, %v3035_v14 }
 0x295   :  { %v1695_v63 = vpop.f32.mrf.mxu1 }
 0x296   :  { %v1696_v20 = vadd.f32 %v3035_v14, %v1695_v63 }
 0x297   :  { %v2446_v2 = vpop.f32.mrf.mxu1 }
 0x298   :  { %1782 = vxpose.xlu1.b32.cont [7/16] (narrow) %v1666_v1, 8  ;;  %1758 = vxpose.xlu0.b32.cont [15/16] (narrow) %v1626_v0, 8  ;;  %v1711_v26 = vadd.f32 %v2446_v2, %v3035_v14 }
 0x299   :  { %v1705_v3 = vpop.f32.mrf.mxu1 }
 0x29a   :  { %v1706_v24 = vadd.f32 %v3035_v14, %v1705_v3 }
 0x29b   :  { %v2449_v6 = vpop.f32.mrf.mxu1 }
 0x29c   :  { %1783 = vxpose.xlu1.b32.cont [8/16] (narrow) %v1671_v5, 8  ;;  %1759 = vxpose.xlu0.b32.end [16/16] (narrow) %v1631_v4, 8  ;;  %v1721_v12 = vadd.f32 %v2449_v6, %v3035_v14 }
 0x29d   :  { %v1715_v7 = vpop.f32.mrf.mxu1 }
 0x29e   :  { %v1716_v9 = vadd.f32 %v3035_v14, %v1715_v7 }
 0x29f   :  { %v2452_v10 = vpop.f32.mrf.mxu1 }
 0x2a0   :  { %1784 = vxpose.xlu1.b32.cont [9/16] (narrow) %v1676_v8, 8  ;;  %1808 = vxpose.xlu0.b32.start [1/6] (short) (narrow) %v1716_v9, 8  ;;  %v1731_v25 = vadd.f32 %v2452_v10, %v3035_v14 }
 0x2a1   :  { %v1725_v13 = vpop.f32.mrf.mxu1 }
 0x2a2   :  { %v1726_v16 = vadd.f32 %v3035_v14, %v1725_v13 }
 0x2a3   :  { %v2455_v17 = vpop.f32.mrf.mxu1 }
 0x2a4   :  { %1785 = vxpose.xlu1.b32.cont [10/16] (narrow) %v1681_v11, 8  ;;  %1809 = vxpose.xlu0.b32.cont [2/6] (short) (narrow) %v1721_v12, 8  ;;  %v1741_v23 = vadd.f32 %v2455_v17, %v3035_v14 }
 0x2a5   :  { %v1735_v19 = vpop.f32.mrf.mxu1 }
 0x2a6   :  { %v1736_v21 = vadd.f32 %v3035_v14, %v1735_v19 }
 0x2a8   :  { %1786 = vxpose.xlu1.b32.cont [11/16] (narrow) %v1686_v15, 8  ;;  %1810 = vxpose.xlu0.b32.cont [3/6] (short) (narrow) %v1726_v16, 8 }
 0x2ac   :  { %1787 = vxpose.xlu1.b32.cont [12/16] (narrow) %v1691_v18, 8  ;;  %1811 = vxpose.xlu0.b32.cont [4/6] (short) (narrow) %v1731_v25, 8 }
 0x2b0   :  { %1788 = vxpose.xlu1.b32.cont [13/16] (narrow) %v1696_v20, 8  ;;  %1812 = vxpose.xlu0.b32.cont [5/6] (short) (narrow) %v1736_v21, 8 }
 0x2b4   :  { %1789 = vxpose.xlu1.b32.cont [14/16] (narrow) %v1701_v22, 8  ;;  %1813 = vxpose.xlu0.b32.end [6/6] (short) (narrow) %v1741_v23, 8 }
 0x2b8   :  { %1790 = vxpose.xlu1.b32.cont [15/16] (narrow) %v1706_v24, 8 }
 0x2bc   :  { %1791 = vxpose.xlu1.b32.end [16/16] (narrow) %v1711_v26, 8 }
 0x2dc   :  { %v1760_v33 = vpop.trf.xlu0 }
 0x2fc   :  { %v1792_v32 = vpop.trf.xlu1 }
 0x2fd   :  { %v1843_v35 = vcombine.low %v1760_v33, %v1792_v32 }
 0x2ff   :  { %v1850_v37 = vrot.slane %v1843_v35, %v1849_v34 }
 0x31c   :  { %v1824_v36 = vpop.trf.xlu0 }
 0x31d   :  { %v1857_v38 = vrot.slane %v1824_v36, %v1849_v34 }
 0x31f   :  { %v1858_v39 = vcombine.low %v1850_v37, %v1857_v38 }
 0x321   :  { %v1865_v40 = vrot.slane %v1858_v39, %v1849_v34 }
 0x323   :  { %1871 = vst.msk [vmem:[#allocation3] sm:$0x7] %vm1869_vm5, %v1865_v40 }
 0x324   :  { %2470 = shalt.err (!%p2467_p4)
}
 0x325   :  { %1881 = dma.vmem_to_hbm [thread:$0]  %s1879_s13, 48, %s3087_s9, [#allocation4]  }
 0x326   :  { %2479 = dma.done.wait [#allocation4], 48  }
 0x327   :  { %2480 = vsyncadd [#allocation4], 4294967248 }
 0x328   :  { %1885 = vsyncpa [#allocation4], 1 }

</bundles_post_ra>
